<compile_context>
chip_gen: v7x
topology: tpu7x:2x2x1
jax: 0.10.0
libtpu: 0.0.40
codegen_flags: <defaults>
</compile_context>

<pallas_src>
import functools

import jax
import jax.numpy as jnp
from jax.experimental import pallas as pl
from jax.experimental.pallas import tpu as pltpu


def _round_up(x, m):
    return ((x + m - 1) // m) * m


def _eup_supports_bf16():
    """True on v6e/v7x (bf16 EUP/VPU); False on v5 and older."""
    try:
        kind = jax.devices()[0].device_kind.lower()
    except Exception:
        return True
    for tag in ("v2", "v3", "v4", "v5"):
        if tag in kind:
            return False
    return True


def _choose_row_tile(M, tm):
    """Row tile: multiple of 16, <= tm, and keeping the grid >= 2 steps when
    M allows (so v7x megacore sharding via 'parallel' actually has work)."""
    tm = max(16, (int(tm) // 16) * 16)
    half = _round_up(pl.cdiv(M, 2), 16)
    tm_eff = min(tm, max(16, half))
    M_pad = _round_up(M, tm_eff)
    return tm_eff, M_pad


def _tts_kernel(x_ref, wm_ref, bm_ref, wv_ref, bv_ref, mel_ref, wav_ref,
                *, bf16_tanh):
    # x_ref:   (tm, D)        f32   input-feature rows (rows = flattened B*T)
    # wm_ref:  (D, n_mels)    bf16  melspec weight, pre-transposed (resident)
    # bm_ref:  (1, n_mels)    f32   melspec bias
    # wv_ref:  (n_mels, U)    bf16  vocoder weight (resident)
    # bv_ref:  (1, U)         f32   vocoder bias
    # mel_ref: (tm, n_mels)   bf16  mel output rows
    # wav_ref: (tm, U)        f32   wav output rows

    # melspec_generator: per-row linear + tanh.  In-kernel f32->bf16 cast of
    # the activation (hides under DMA, saves a wrapper-side HBM pass), MXU
    # matmul with f32 accumulation.
    x = x_ref[...].astype(jnp.bfloat16)
    acc = (
        jnp.dot(x, wm_ref[...], preferred_element_type=jnp.float32)
        + bm_ref[...]
    )  # (tm, n_mels) f32
    if bf16_tanh:
        # v6e/v7x: bf16 EUP -> cheaper tanh, dovetails with the bf16 store.
        mel = jnp.tanh(acc.astype(jnp.bfloat16))
    else:
        # v5e and older: no bf16 EUP; keep the transcendental in f32.
        mel = jnp.tanh(acc).astype(jnp.bfloat16)
    mel_ref[...] = mel  # bf16 writeback (half the bytes of f32)

    # wav_generator: transposed-conv1d with kernel==stride==U -> MXU matmul.
    wav = jnp.tanh(
        jnp.dot(mel, wv_ref[...], preferred_element_type=jnp.float32)
        + bv_ref[...]
    )  # (tm, U) f32
    wav_ref[...] = wav


@functools.partial(jax.jit, static_argnames=("tm", "bf16_tanh"))
def _tts_forward_impl(x, w_mel, b_mel, w_voc, b_voc, *, tm, bf16_tanh):
    B, T, D = x.shape
    n_mels = w_mel.shape[0]
    U = w_voc.shape[1]
    M = B * T

    tm_eff, M_pad = _choose_row_tile(M, tm)
    grid = M_pad // tm_eff

    # ---- wrapper-side layout plumbing (x stays f32; weights are tiny) ----
    x2 = x.reshape(M, D)
    if M_pad != M:
        x2 = jnp.pad(x2, ((0, M_pad - M), (0, 0)))

    wm_t = w_mel.T.astype(jnp.bfloat16)                    # (D, n_mels)
    bm = b_mel.reshape(1, n_mels).astype(jnp.float32)
    wv = w_voc.astype(jnp.bfloat16)                        # (n_mels, U)
    bv = b_voc.reshape(1, U).astype(jnp.float32)

    flops = 2 * M_pad * D * n_mels + 2 * M_pad * n_mels * U
    transcendentals = M_pad * (n_mels + U)
    bytes_accessed = (
        M_pad * D * 4            # x (f32 in)
        + M_pad * n_mels * 2     # mel (bf16 out)
        + M_pad * U * 4          # wav (f32 out)
        + D * n_mels * 2 + n_mels * U * 2 + (n_mels + U) * 4  # weights/biases
    )

    mel_p, wav_p = pl.pallas_call(
        functools.partial(_tts_kernel, bf16_tanh=bf16_tanh),
        out_shape=(
            jax.ShapeDtypeStruct((M_pad, n_mels), jnp.bfloat16),
            jax.ShapeDtypeStruct((M_pad, U), jnp.float32),
        ),
        grid_spec=pltpu.PrefetchScalarGridSpec(
            num_scalar_prefetch=0,
            grid=(grid,),
            in_specs=[
                pl.BlockSpec((tm_eff, D), lambda i: (i, 0)),     # x rows (stream)
                pl.BlockSpec((D, n_mels), lambda i: (0, 0)),     # w_mel^T (resident)
                pl.BlockSpec((1, n_mels), lambda i: (0, 0)),     # b_mel
                pl.BlockSpec((n_mels, U), lambda i: (0, 0)),     # w_voc (resident)
                pl.BlockSpec((1, U), lambda i: (0, 0)),          # b_voc
            ],
            out_specs=(
                pl.BlockSpec((tm_eff, n_mels), lambda i: (i, 0)),  # mel rows
                pl.BlockSpec((tm_eff, U), lambda i: (i, 0)),       # wav rows
            ),
        ),
        compiler_params=pltpu.CompilerParams(
            dimension_semantics=("parallel",),
            vmem_limit_bytes=48 * 1024 * 1024,
        ),
        cost_estimate=pl.CostEstimate(
            flops=flops,
            transcendentals=transcendentals,
            bytes_accessed=bytes_accessed,
        ),
    )(x2, wm_t, bm, wv, bv)

    # Row-padding strip only (no-op when tm divides M); layouts are reshapes.
    mel = mel_p[:M].reshape(B, T, n_mels)       # TIME-MAJOR (B, T, n_mels), bf16
    wav = wav_p[:M].reshape(B, 1, T * U)        # (B, 1, T') f32 -- PyTorch contract
    return {"wav": wav, "melspectrogram": mel}


def tts_forward(x, w_mel, b_mel, w_voc, b_voc, tm=1024, bf16_tanh=None):
    """x: (B, T, D) float32.

    Returns dict with:
      'wav':            (B, 1, T*U) f32  -- matches the PyTorch output contract.
      'melspectrogram': (B, T, n_mels) bf16, TIME-MAJOR (transpose for (B,n_mels,T)).
    """
    if bf16_tanh is None:
        bf16_tanh = _eup_supports_bf16()
    return _tts_forward_impl(x, w_mel, b_mel, w_voc, b_voc,
                             tm=tm, bf16_tanh=bool(bf16_tanh))


def _reference(x, w_mel, b_mel, w_voc, b_voc):
    # Pure-JAX f32 reference for correctness checking.
    mel = jnp.tanh(jnp.einsum("btd,md->btm", x, w_mel) + b_mel[None, None, :])
    wav = jnp.tanh(jnp.einsum("btm,mu->btu", mel, w_voc) + b_voc[None, None, :])
    B, T, _ = x.shape
    return {"wav": wav.reshape(B, 1, -1), "melspectrogram": mel}


if __name__ == "__main__":
    def _check(case_idx, B, T, D, n_mels, U):
        key = jax.random.fold_in(jax.random.PRNGKey(0), case_idx)
        kx, kwm, kbm, kwv, kbv = jax.random.split(key, 5)

        x = jax.random.normal(kx, (B, T, D), dtype=jnp.float32)
        w_mel = jax.random.normal(kwm, (n_mels, D), dtype=jnp.float32) * 0.1
        b_mel = jax.random.normal(kbm, (n_mels,), dtype=jnp.float32) * 0.1
        w_voc = jax.random.normal(kwv, (n_mels, U), dtype=jnp.float32) * 0.1
        b_voc = jax.random.normal(kbv, (U,), dtype=jnp.float32) * 0.1

        out = tts_forward(x, w_mel, b_mel, w_voc, b_voc)
        jax.block_until_ready(out)

        ref = _reference(x, w_mel, b_mel, w_voc, b_voc)
        assert out["wav"].shape == (B, 1, T * U)
        assert out["melspectrogram"].shape == (B, T, n_mels)
        # bf16 weights/activations + f32 accumulation -> loosened tolerance.
        assert jnp.allclose(out["wav"], ref["wav"], atol=3e-2, rtol=3e-2)
        assert jnp.allclose(
            out["melspectrogram"].astype(jnp.float32),
            ref["melspectrogram"], atol=3e-2, rtol=3e-2,
        )

    # Small deterministic case (original toy shapes): grid of 2 tiny tiles.
    _check(0, B=2, T=16, D=32, n_mels=16, U=32)
    # Larger case exercising the row tiling (tm cap -> grid=2, 512-row tiles)
    # and true (unpadded) n_mels=80 / U=120 output lane widths.
    _check(1, B=2, T=512, D=128, n_mels=80, U=120)

    print("KERNEL_OK")
</pallas_src>

<mosaic_0001>
module attributes {stable_mosaic.version = 11 : i64} {
  func.func @_tts_kernel(%arg0: i32, %arg1: memref<16x32xf32, #tpu.memory_space<vmem>>, %arg2: memref<32x16xbf16, #tpu.memory_space<vmem>>, %arg3: memref<1x16xf32, #tpu.memory_space<vmem>>, %arg4: memref<16x32xbf16, #tpu.memory_space<vmem>>, %arg5: memref<1x32xf32, #tpu.memory_space<vmem>>, %arg6: memref<16x16xbf16, #tpu.memory_space<vmem>>, %arg7: memref<16x32xf32, #tpu.memory_space<vmem>>) attributes {dimension_semantics = [#tpu.dimension_semantics<parallel>], iteration_bounds = array<i64: 2>, scalar_prefetch = 0 : i64, scratch_operands = 0 : i64, tpu.core_type = #tpu.core_type<tc>, window_params = [{transform_indices = @transform_0, window_bounds = array<i64: 16, 32>}, {pipeline_mode = #tpu.pipeline_mode<synchronous>, transform_indices = @transform_1, window_bounds = array<i64: 32, 16>}, {pipeline_mode = #tpu.pipeline_mode<synchronous>, transform_indices = @transform_2, window_bounds = array<i64: 1, 16>}, {pipeline_mode = #tpu.pipeline_mode<synchronous>, transform_indices = @transform_3, window_bounds = array<i64: 16, 32>}, {pipeline_mode = #tpu.pipeline_mode<synchronous>, transform_indices = @transform_4, window_bounds = array<i64: 1, 32>}, {transform_indices = @transform_5, window_bounds = array<i64: 16, 16>}, {transform_indices = @transform_6, window_bounds = array<i64: 16, 32>}]} {
    %c0 = arith.constant 0 : index
    %c0_0 = arith.constant 0 : index
    %0 = vector.load %arg1[%c0, %c0_0] : memref<16x32xf32, #tpu.memory_space<vmem>>, vector<16x32xf32>
    %1 = arith.truncf %0 : vector<16x32xf32> to vector<16x32xbf16>
    %c0_1 = arith.constant 0 : index
    %c0_2 = arith.constant 0 : index
    %2 = vector.load %arg2[%c0_1, %c0_2] : memref<32x16xbf16, #tpu.memory_space<vmem>>, vector<32x16xbf16>
    %cst = arith.constant dense<0.000000e+00> : vector<16x16xf32>
    %3 = tpu.matmul %1, %2, %cst {dimension_numbers = #tpu.dot_dimension_numbers<[1], [0], [0], [1], [0, 0, 1, 1], [], []>} : vector<16x32xbf16>, vector<32x16xbf16>, vector<16x16xf32> -> vector<16x16xf32>
    %c0_3 = arith.constant 0 : index
    %c0_4 = arith.constant 0 : index
    %4 = vector.load %arg3[%c0_3, %c0_4] : memref<1x16xf32, #tpu.memory_space<vmem>>, vector<1x16xf32>
    %5 = vector.broadcast %4 : vector<1x16xf32> to vector<16x16xf32>
    %6 = arith.addf %3, %5 : vector<16x16xf32>
    %7 = arith.truncf %6 : vector<16x16xf32> to vector<16x16xbf16>
    %8 = math.tanh %7 : vector<16x16xbf16>
    %c0_5 = arith.constant 0 : index
    %c0_6 = arith.constant 0 : index
    %9 = vector.load %arg6[%c0_5, %c0_6] : memref<16x16xbf16, #tpu.memory_space<vmem>>, vector<16x16xbf16>
    tpu.vector_store %arg6[%c0_5, %c0_6], %8 {strides = array<i32>} : memref<16x16xbf16, #tpu.memory_space<vmem>>, vector<16x16xbf16>,
    %c0_7 = arith.constant 0 : index
    %c0_8 = arith.constant 0 : index
    %10 = vector.load %arg4[%c0_7, %c0_8] : memref<16x32xbf16, #tpu.memory_space<vmem>>, vector<16x32xbf16>
    %cst_9 = arith.constant dense<0.000000e+00> : vector<16x32xf32>
    %11 = tpu.matmul %8, %10, %cst_9 {dimension_numbers = #tpu.dot_dimension_numbers<[1], [0], [0], [1], [0, 0, 1, 1], [], []>} : vector<16x16xbf16>, vector<16x32xbf16>, vector<16x32xf32> -> vector<16x32xf32>
    %c0_10 = arith.constant 0 : index
    %c0_11 = arith.constant 0 : index
    %12 = vector.load %arg5[%c0_10, %c0_11] : memref<1x32xf32, #tpu.memory_space<vmem>>, vector<1x32xf32>
    %13 = vector.broadcast %12 : vector<1x32xf32> to vector<16x32xf32>
    %14 = arith.addf %11, %13 : vector<16x32xf32>
    %15 = math.tanh %14 : vector<16x32xf32>
    %c0_12 = arith.constant 0 : index
    %c0_13 = arith.constant 0 : index
    %16 = vector.load %arg7[%c0_12, %c0_13] : memref<16x32xf32, #tpu.memory_space<vmem>>, vector<16x32xf32>
    tpu.vector_store %arg7[%c0_12, %c0_13], %15 {strides = array<i32>} : memref<16x32xf32, #tpu.memory_space<vmem>>, vector<16x32xf32>,
    return
  }
  func.func @transform_0(%arg0: i32) -> (i32, i32) {
    %c0_i32 = arith.constant 0 : i32
    %c0_i32_0 = arith.constant 0 : i32
    return %arg0, %c0_i32 : i32, i32
  }
  func.func @transform_1(%arg0: i32) -> (i32, i32) {
    %c0_i32 = arith.constant 0 : i32
    %c0_i32_0 = arith.constant 0 : i32
    %c0_i32_1 = arith.constant 0 : i32
    return %c0_i32, %c0_i32_0 : i32, i32
  }
  func.func @transform_2(%arg0: i32) -> (i32, i32) {
    %c0_i32 = arith.constant 0 : i32
    %c0_i32_0 = arith.constant 0 : i32
    %c0_i32_1 = arith.constant 0 : i32
    return %c0_i32, %c0_i32_0 : i32, i32
  }
  func.func @transform_3(%arg0: i32) -> (i32, i32) {
    %c0_i32 = arith.constant 0 : i32
    %c0_i32_0 = arith.constant 0 : i32
    %c0_i32_1 = arith.constant 0 : i32
    return %c0_i32, %c0_i32_0 : i32, i32
  }
  func.func @transform_4(%arg0: i32) -> (i32, i32) {
    %c0_i32 = arith.constant 0 : i32
    %c0_i32_0 = arith.constant 0 : i32
    %c0_i32_1 = arith.constant 0 : i32
    return %c0_i32, %c0_i32_0 : i32, i32
  }
  func.func @transform_5(%arg0: i32) -> (i32, i32) {
    %c0_i32 = arith.constant 0 : i32
    %c0_i32_0 = arith.constant 0 : i32
    return %arg0, %c0_i32 : i32, i32
  }
  func.func @transform_6(%arg0: i32) -> (i32, i32) {
    %c0_i32 = arith.constant 0 : i32
    %c0_i32_0 = arith.constant 0 : i32
    return %arg0, %c0_i32 : i32, i32
  }
}

</mosaic_0001>

<bundles_post_ra>
// kernel: _tts_forward_impl.1
= control target key start
LH: loop header
LB: loop body
LE: loop exit
PB: predicated region body
PF: predicated region fallthrough
CT: control target
= control target key end

     0   :  { %12 = vsyncpa [#allocation3], 0  ;;  %s854_s0 = inlined_call_operand.vmem [shape: f32[32,32], index: 0, kind: input, shape index: {}]   ;;  %s855_s1 = inlined_call_operand.vmem [shape: bf16[32,16], index: 1, kind: input, shape index: {}]   ;;  %s856_s2 = inlined_call_operand.vmem [shape: f32[1,16], index: 2, kind: input, shape index: {}]   ;;  %s857_s3 = inlined_call_operand.vmem [shape: bf16[16,32], index: 3, kind: input, shape index: {}]   ;;  %s858_s4 = inlined_call_operand.vmem [shape: f32[1,32], index: 4, kind: input, shape index: {}]   ;;  %s859_s5 = inlined_call_operand.hbm [shape: bf16[32,16], index: 5, kind: output, shape index: {0}]   ;;  %s860_s6 = inlined_call_operand.vmem [shape: f32[32,32], index: 6, kind: output, shape index: {1}]  }
   0x1   :  { %14 = vsyncpa [#allocation3 + $0x1], 0  ;;  %s724_s21 = smov 0   ;;  %s726_s22 = smov 0  }
   0x2   :  { %s728_s23 = smov 0   ;;  %s730_s24 = smov 0  }
   0x3 LB: > { %s745_s25 = sadd.s32 4294967295, %s682_s24   ;;  %s525_s26 = sadd.s32 4294967294, %s682_s24   ;;  %s682_s24 = sphi %s730_s24, %s866_s24   ;;  %s678_s23 = sphi %s728_s23, %s865_s23   ;;  %s674_s22 = sphi %s726_s22, %s864_s22   ;;  %s670_s21 = sphi %s724_s21, %s863_s21  }
   0x4   : > { %s749_s27 = sadd.s32 1, %s682_s24   ;;  %s137_s28 = sadd.s32 1, %s678_s23 }
   0x5   : > { %s134_s29 = ssub.s32 %s682_s24, %s749_s27  ;;  %p147_p0 = scmp.ne.s32.totalorder %s678_s23, %s674_s22 }
   0x6   : > { %p135_p1 = scmp.eq.s32.totalorder %s134_s29, 0  ;;  %p148_p2 = scmp.eq.s32.totalorder %s745_s25, 1 }
   0x7   : > { %p153_p3 = scmp.ne.s32.totalorder %s674_s22, %s670_s21  ;;  %p154_p4 = scmp.eq.s32.totalorder %s525_s26, 1 }
   0x8   : > { %s760_s30 = scalar_select %p135_p1, %s678_s23, %s137_s28  }
   0x9   : > { %p762_p5 = por %p148_p2, %p147_p0  ;;  %p766_p6 = por %p154_p4, %p153_p3 }
   0xa   : > { %p528_p7 = scmp.ge.s32.totalorder %s682_s24, 1  ;;  %p219_p8 = scmp.lt.s32.totalorder %s682_s24, 3 }
   0xc   : > { %p220_p9 = pnand %p528_p7, %p219_p8 }
   0xd   : > { %v611_v0 = vld [vmem:[%s855_s1] sm:$0xff] (!%p220_p9)   ;;  %v684_v1 = vmov (!%p220_p9), 0.0   ;;  %v612_v2 = vld [vmem:[%s855_s1 + $0x8] sm:$0xff] (!%p220_p9)   ;;  %vm685_vm0 = vmmov (!%p220_p9), 0   ;;  %s530_s13 = sshll.u32 (!%p220_p9), %s745_s25, 1  ;;  %vm294_vm1 = vcmask (!%p220_p9), 261120  }
   0xe   : > { %223 = sbr.rel (%p220_p9) target bundleno = 485 (0x1e5), region = 40  ;;  %554 = vmatprep.subr.bf16.mxu0 (!%p220_p9), %v684_v1  ;;  %562 = vmatprep.subr.bf16.mxu1 (!%p220_p9), %v684_v1  ;;  %p255_p10 = scmp.lt.s32.totalorder (!%p220_p9), %s530_s13, 3  ;;  %v613_v6 = vld [vmem:[%s857_s3] sm:$0xff] (!%p220_p9)   ;;  %vm366_vm2 = vcmask (!%p220_p9), 130048   ;;  %vm348_vm3 = vcmask (!%p220_p9), 125952  }
   0xf   : > { %555 = vmatpush3.bf16.msra.mxu0 (!%p220_p9), %v611_v0  ;;  %558 = vmatprep.mubr.msk.bf16.mxu0 (!%p220_p9), %vm685_vm0, %v684_v1  ;;  %v534_v7 = vld [vmem:[%s856_s2] ss:$0 sm:$0xff] (!%p220_p9)  ;;  %s244_s28 = sand.u32 (!%p220_p9), 1, %s674_s22   ;;  %s548_s10 = sshll.u32 (!%p220_p9), %s745_s25, 7 }
  0x10   : > { %556 = vmatprep.subr.bf16.mxu0 (!%p220_p9), %v684_v1  ;;  %564 = vmatprep.mubr.msk.bf16.mxu1 (!%p220_p9), %vm685_vm0, %v684_v1  ;;  %s529_s29 = sshll.u32 (!%p220_p9), %s244_s28, 3  ;;  %s799_s16 = scalar_lea.hbm (!%p220_p9), %s859_s5, %s548_s10 }
  0x11   : > { %563 = vmatpush3.bf16.msra.mxu1 (!%p220_p9), %v613_v6  ;;  %s246_s9 = scalar_lea.vmem (!%p220_p9), [#allocation2], %s529_s29  ;;  %s686_s19 = smov (!%p220_p9), [#allocation2]  }
  0x12   : > { %s434_s11 = sshll.u32 (!%p220_p9), %s246_s9, 4  ;;  %s624_s25 = sshll.u32 (!%p220_p9), %s686_s19, 4  ;;  %s801_s11 = int_to_ptr.vmem [resolvable:$true] %s434_s11  ;;  %s625_s25 = int_to_ptr.vmem [resolvable:$false] %s624_s25 }
  0x13   : > { %557 = vmatpush3.bf16.msra.mxu0 (!%p220_p9), %v612_v2  ;;  %s620_s18 = scalar_lea.vmem (!%p220_p9), %s801_s11, 128  ;;  %s626_s20 = scalar_lea.vmem (!%p220_p9), %s625_s25, 256 }
  0x14   : > { %p621_p11 = scmp.ne.s32.totalorder (!%p220_p9), %s801_s11, %s620_s18  ;;  %p627_p0 = scmp.lt.s32.totalorder (!%p220_p9), %s801_s11, %s625_s25 }
  0x15   : > { %s868_s13 = smov (!%p255_p10, %s530_s13), 3  ;;  %p628_p1 = scmp.lt.s32.totalorder %s626_s20, %s620_s18 }
  0x16   : > { %s531_s14 = sshll.u32 %s868_s13, 3  ;;  %p622_p12 = pnand %p621_p11, %p762_p5 }
  0x17   : > { %s258_s17 = scalar_lea.vmem %s854_s0, %s531_s14  ;;  %p629_p2 = por %p628_p1, %p627_p0 }
  0x18   : > { %v268_v3 = vld [vmem:[%s258_s17] sm:$0xff]  ;;  %v269_v4 = vld [vmem:[%s258_s17 + $0x8] sm:$0xff]  ;;  %s803_s17 = scalar_lea.sflag [#allocation3], %s244_s28  ;;  %p623_p13 = pneg %p622_p12 }
  0x19   : > { %v270_v5 = vpack.c.bf16 %v269_v4, %v268_v3 }
  0x1a   : > { %p630_p3 = pnand %p629_p2, %p623_p13 }
  0x1b   : > { %559 = vmatmul.mubr.msk.bf16.vlgmr.msra.gmra.mrb[0].mxu0 %vm294_vm1, %v270_v5 }
  0xee   : > { %v332_v8 = vpop.f32.mrb[0].mxu0 }
  0xef   : > { %v560_v9 = vpop.f32.mrb[1].mxu0  ;;  %v333_v11 = vadd.f32 %v534_v7, %v332_v8 }
  0xf0   : > { %v335_v10 = vpop.f32.mrb[2].mxu0 }
  0xf1   : > { %v336_v12 = vadd.f32 %v534_v7, %v335_v10  ;;  %v561_v13 = vpop.f32.mrb[3].mxu0 }
  0xf3   : > { %v339_v14 = vpack.c.bf16 %v336_v12, %v333_v11 }
  0xf5   : > { %614 = vtanh.bf16 %v339_v14 }
 0x100   : > { %v615_v15 = vpop.eup %614 }
 0x101   : > { %565 = vmatmul.mubr.msk.bf16.vlgmr.msra.gmra.mrb[0].mxu1 %vm366_vm2, %v615_v15  ;;  %v538_v16 = vcombine.low %v615_v15, %v615_v15  ;;  %v539_v17 = vcombine.high %v615_v15, %v615_v15 }
 0x103   : > { %349 = vst.msk [vmem:[%s246_s9] sm:$0xf] %vm348_vm3, %v538_v16  ;;  %350 = vst.msk [vmem:[%s246_s9 + $0x4] sm:$0xf] %vm348_vm3, %v539_v17 }
 0x104   : > { %633 = shalt.err (!%p630_p3)
}
 0x105   : > { %s634_s26 = scalar_lea.hbm %s799_s16, 128  ;;  %s638_s9 = scalar_lea.hbm %s859_s5, 256 }
 0x106   : > { %p635_p4 = scmp.ne.s32.totalorder %s799_s16, %s634_s26  ;;  %p639_p9 = scmp.lt.u32.totalorder %s799_s16, %s859_s5 }
 0x107   : > { %p640_p10 = scmp.lt.u32.totalorder %s638_s9, %s634_s26  ;;  %p642_p12 = scmp.lt.u32.totalorder %s634_s26, %s799_s16 }
 0x108   : > { %p636_p7 = pnand %p635_p4, %p762_p5 }
 0x109   : > { %p641_p11 = por %p640_p10, %p639_p9 }
 0x10a   : > { %p637_p8 = pneg %p636_p7 }
 0x10b   : > { %p643_p13 = por %p642_p12, %p641_p11 }
 0x10d   : > { %p644_p0 = pnand %p643_p13, %p637_p8 }
 0x10f   : > { %647 = shalt.err (!%p644_p0)
}
 0x110   : > { %s687_s15 = smov 64   ;;  %s688_s18 = smov 4   ;;  %v540_v18 = vld [vmem:[%s858_s4] ss:$0 sm:$0xff] }
 0x111   : > { %568 = dma.vmem_to_hbm [thread:$0]  (%p762_p5), %s801_s11, 128, %s799_s16, %s803_s17, %s687_s15, %s687_s15, %s688_s18  }
 0x112   : > { %s265_s28 = scalar_lea.vmem %s860_s6, %s531_s14 }
 0x1d4   : > { %v404_v19 = vpop.f32.mrb[0].mxu1 }
 0x1d5   : > { %v405_v20 = vadd.f32 %v540_v18, %v404_v19  ;;  %v566_v21 = vpop.f32.mrb[1].mxu1 }
 0x1d6   : > { %v407_v22 = vpop.f32.mrb[2].mxu1 }
 0x1d7   : > { %616 = vtanh.f32 %v405_v20  ;;  %v408_v23 = vadd.f32 %v540_v18, %v407_v22  ;;  %v567_v24 = vpop.f32.mrb[3].mxu1 }
 0x1d9   : > { %618 = vtanh.f32 %v408_v23 }
 0x1e1   : > { %v617_v25 = vpop.eup %616 }
 0x1e2   : > { %413 = vst.msk [vmem:[%s265_s28] sm:$0xff] %vm294_vm1, %v617_v25 }
 0x1e3   : > { %v619_v26 = vpop.eup %618 }
 0x1e4   : > { %414 = vst.msk [vmem:[%s265_s28 + $0x8] sm:$0xff] %vm294_vm1, %v619_v26 }
 0x1e5 PF: > { %p574_p5 = scmp.ge.s32.totalorder %s682_s24, 2  ;;  %s453_s7 = sand.u32 1, %s670_s21  }
 0x1e6   : > { %s454_s11 = scalar_lea.sflag [#allocation3], %s453_s7 }
 0x1e7   : > { %p571_p1 = pnand %p574_p5, %p766_p6 }
 0x1e9   : > { %665 = dma.done.wait (!%p571_p1), %s454_s11, 128  }
 0x1ea   : > { %667 = vsyncadd (!%p571_p1), %s454_s11, 4294967168  ;;  %p17_p2 = scmp.ge.s32.totalorder %s749_s27, 4   ;;  %s863_s21 = smov %s674_s22 }
 0x1eb   : > { %s864_s22 = smov %s678_s23  ;;  %s865_s23 = smov %s760_s30 }
 0x1ec   : > { %s866_s24 = smov %s749_s27  ;;  %19 = sbr.rel (!%p17_p2) target bundleno = 3 (0x3), region = 87 }
 0x1f3   :  { %467 = vsyncpa [#allocation3], 1 }
 0x1f4   :  { %469 = vsyncpa [#allocation3 + $0x1], 1 }

</bundles_post_ra>
